<compile_context>
chip_gen: v7x
topology: tpu7x:2x2x1
jax: 0.10.0
libtpu: 0.0.40
codegen_flags: <defaults>
</compile_context>

<pallas_src>
import functools

import jax
import jax.numpy as jnp
from jax.experimental import pallas as pl
from jax.experimental.pallas import tpu as pltpu


# ---- packed "head" parameter slab layout (row offsets, 64-lane columns) ----
_HEAD_T2_ROW = 0      # t2' = b2*s2 + t2        -> [1, 64]
_HEAD_WL1_ROW = 8     # lin1 weight (64 -> 16)  -> [64, 16] in cols 0:16
_HEAD_BL1_ROW = 72    # lin1 bias               -> [1, 16]  in cols 0:16
_HEAD_WL2_ROW = 80    # lin2 weight (16 -> 6)   -> [16, 6]  in cols 0:6
_HEAD_BL2_ROW = 96    # lin2 bias               -> [1, 6]   in cols 0:6
_HEAD_ROWS = 104      # padded to a multiple of 8 sublanes
_HEAD_COLS = 64


def gcn_stage1_kernel(a_ref, x_ref, w1t1_ref, w2_ref, g_ref, *, mxu_dtype):
    """Per row tile: g = relu((A@x) * w1' + t1') @ W2'  (layer 1 + layer-2 weight)."""
    a = a_ref[...].astype(mxu_dtype)                          # [tm, N]
    x = x_ref[...].astype(mxu_dtype)                          # [N, 1]
    ax = jnp.dot(a, x, preferred_element_type=jnp.float32)    # [tm, 1]
    w1_eff = w1t1_ref[0:1, :]                                 # [1, 256] = W1 * s1
    t1_eff = w1t1_ref[1:2, :]                                 # [1, 256] = b1*s1 + t1
    # VPU broadcast outer product replaces the K=1 MXU matmul; dropout = identity.
    h1 = jnp.maximum(ax * w1_eff + t1_eff, 0.0)               # [tm, 256]
    g_ref[...] = jnp.dot(h1.astype(mxu_dtype), w2_ref[...].astype(mxu_dtype),
                         preferred_element_type=jnp.float32)  # [tm, 64]


def gcn_stage2_kernel(a_ref, g_ref, head_ref, o_ref, *, mxu_dtype):
    """Per row tile: h2 = relu(A@g + t2'); MLP head; log_softmax."""
    a = a_ref[...].astype(mxu_dtype)                          # [tm, N]
    g = g_ref[...].astype(mxu_dtype)                          # [N, 64] (resident)
    h2 = jnp.dot(a, g, preferred_element_type=jnp.float32)    # [tm, 64]
    t2 = head_ref[_HEAD_T2_ROW:_HEAD_T2_ROW + 1, :]           # [1, 64] = b2*s2 + t2
    h2 = jnp.maximum(h2 + t2, 0.0)                            # BN folded + ReLU

    wl1 = head_ref[_HEAD_WL1_ROW:_HEAD_WL1_ROW + 64, 0:16]    # [64, 16]
    bl1 = head_ref[_HEAD_BL1_ROW:_HEAD_BL1_ROW + 1, 0:16]     # [1, 16]
    wl2 = head_ref[_HEAD_WL2_ROW:_HEAD_WL2_ROW + 16, 0:6]     # [16, 6]
    bl2 = head_ref[_HEAD_BL2_ROW:_HEAD_BL2_ROW + 1, 0:6]      # [1, 6]

    h3 = jnp.maximum(jnp.dot(h2, wl1, preferred_element_type=jnp.float32) + bl1, 0.0)
    z = jnp.dot(h3, wl2, preferred_element_type=jnp.float32) + bl2   # [tm, 6]

    # log_softmax along dim=1
    m = jnp.max(z, axis=1, keepdims=True)
    e = jnp.exp(z - m)
    o_ref[...] = z - (jnp.log(jnp.sum(e, axis=1, keepdims=True)) + m)


def _pick_row_tile(n, max_tile):
    """Largest power-of-two tile (>=8) that divides n; else the full n."""
    t = max(8, min(max_tile, n))
    while t >= 8:
        if n % t == 0:
            return t
        t //= 2
    return n


def fold_params(p):
    """Fold BatchNorm scale/shift into conv weights; pack the small head params."""
    w1_eff = p["w1"] * p["s1"]                       # [1, 256]
    t1_eff = p["b1"] * p["s1"] + p["t1"]             # [1, 256]
    w1t1 = jnp.concatenate([w1_eff, t1_eff], axis=0).astype(jnp.float32)

    w2_eff = (p["w2"] * p["s2"]).astype(jnp.float32)  # [256, 64] column scaling
    t2_eff = p["b2"] * p["s2"] + p["t2"]              # [1, 64]

    head = jnp.zeros((_HEAD_ROWS, _HEAD_COLS), jnp.float32)
    head = head.at[_HEAD_T2_ROW:_HEAD_T2_ROW + 1, :].set(t2_eff)
    head = head.at[_HEAD_WL1_ROW:_HEAD_WL1_ROW + 64, 0:16].set(p["wl1"])
    head = head.at[_HEAD_BL1_ROW:_HEAD_BL1_ROW + 1, 0:16].set(p["bl1"])
    head = head.at[_HEAD_WL2_ROW:_HEAD_WL2_ROW + 16, 0:6].set(p["wl2"])
    head = head.at[_HEAD_BL2_ROW:_HEAD_BL2_ROW + 1, 0:6].set(p["bl2"])
    return w1t1, w2_eff, head


def net_forward(a_hat, x, params, *, row_tile=256, mxu_dtype=jnp.float32):
    """Full Net forward as two row-tiled Pallas calls."""
    N = x.shape[0]
    tm = _pick_row_tile(N, row_tile)
    grid = (N // tm,)
    w1t1, w2_eff, head = fold_params(params)

    row = lambda i: (i, 0)
    const = lambda i: (0, 0)
    cparams = pltpu.CompilerParams(dimension_semantics=("parallel",))

    # Stage 1: g = relu((A@x) * w1' + t1') @ W2'            -> [N, 64]
    g = pl.pallas_call(
        functools.partial(gcn_stage1_kernel, mxu_dtype=mxu_dtype),
        out_shape=jax.ShapeDtypeStruct((N, 64), jnp.float32),
        grid=grid,
        in_specs=[pl.BlockSpec((tm, N), row),        # A_hat row tile
                  pl.BlockSpec((N, 1), const),       # x (resident)
                  pl.BlockSpec((2, 256), const),     # packed w1'/t1'
                  pl.BlockSpec((256, 64), const)],   # W2'
        out_specs=pl.BlockSpec((tm, 64), row),
        compiler_params=cparams,
    )(a_hat, x, w1t1, w2_eff)

    # Stage 2: out = log_softmax(head(relu(A@g + t2')))      -> [N, 6]
    out = pl.pallas_call(
        functools.partial(gcn_stage2_kernel, mxu_dtype=mxu_dtype),
        out_shape=jax.ShapeDtypeStruct((N, 6), jnp.float32),
        grid=grid,
        in_specs=[pl.BlockSpec((tm, N), row),                     # A_hat row tile
                  pl.BlockSpec((N, 64), const),                   # g (resident)
                  pl.BlockSpec((_HEAD_ROWS, _HEAD_COLS), const)],  # packed head
        out_specs=pl.BlockSpec((tm, 6), row),
        compiler_params=cparams,
    )(a_hat, g, head)
    return out


def build_normalized_adjacency(edge_index, num_nodes):
    """A_hat = D^{-1/2} (A + I) D^{-1/2}, dense, as used by GCNConv."""
    src, dst = edge_index
    adj = jnp.zeros((num_nodes, num_nodes), jnp.float32)
    adj = adj.at[dst, src].set(1.0)
    # Guard: don't double-count self-loops already present in edge_index.
    adj = jnp.maximum(adj, jnp.eye(num_nodes, dtype=jnp.float32))
    deg = jnp.sum(adj, axis=1)
    dinv = 1.0 / jnp.sqrt(jnp.maximum(deg, 1.0))
    return adj * dinv[:, None] * dinv[None, :]


def fold_batchnorm(gamma, beta, running_mean, running_var, eps=1e-5):
    s = gamma / jnp.sqrt(running_var + eps)
    t = beta - running_mean * s
    return s[None, :], t[None, :]


def init_params(key):
    ks = jax.random.split(key, 12)

    def lin(k, fan_in, fan_out):
        return jax.random.normal(k, (fan_in, fan_out), jnp.float32) * (1.0 / jnp.sqrt(fan_in))

    # GCNConv weights (stored as [in, out]) and biases
    w1 = lin(ks[0], 1, 256)
    b1 = jax.random.normal(ks[1], (1, 256), jnp.float32) * 0.01
    w2 = lin(ks[2], 256, 64)
    b2 = jax.random.normal(ks[3], (1, 64), jnp.float32) * 0.01
    # BatchNorm1d(256) / BatchNorm1d(64) — deterministic running stats / affine
    g1 = 1.0 + 0.1 * jax.random.normal(ks[4], (256,), jnp.float32)
    be1 = 0.1 * jax.random.normal(ks[5], (256,), jnp.float32)
    rm1 = 0.1 * jax.random.normal(ks[6], (256,), jnp.float32)
    rv1 = jnp.abs(1.0 + 0.1 * jax.random.normal(ks[7], (256,), jnp.float32))
    s1, t1 = fold_batchnorm(g1, be1, rm1, rv1)
    g2 = jnp.ones((64,), jnp.float32)
    be2 = jnp.zeros((64,), jnp.float32)
    rm2 = jnp.zeros((64,), jnp.float32)
    rv2 = jnp.ones((64,), jnp.float32)
    s2, t2 = fold_batchnorm(g2, be2, rm2, rv2)
    # lin1: 64 -> 16, lin2: 16 -> 6
    wl1 = lin(ks[8], 64, 16)
    bl1 = jax.random.normal(ks[9], (1, 16), jnp.float32) * 0.01
    wl2 = lin(ks[10], 16, 6)
    bl2 = jax.random.normal(ks[11], (1, 6), jnp.float32) * 0.01

    return dict(w1=w1, b1=b1, s1=s1, t1=t1,
                w2=w2, b2=b2, s2=s2, t2=t2,
                wl1=wl1, bl1=bl1, wl2=wl2, bl2=bl2)


def reference_forward(a_hat, x, p):
    h = a_hat @ (x @ p["w1"]) + p["b1"]
    h = jnp.maximum(h * p["s1"] + p["t1"], 0.0)
    h = a_hat @ (h @ p["w2"]) + p["b2"]
    h = jnp.maximum(h * p["s2"] + p["t2"], 0.0)
    h = jnp.maximum(h @ p["wl1"] + p["bl1"], 0.0)
    z = h @ p["wl2"] + p["bl2"]
    return jax.nn.log_softmax(z, axis=1)


if __name__ == "__main__":
    key = jax.random.PRNGKey(0)
    k_x, k_p = jax.random.split(key)

    N = 128  # number of graph nodes (row_tile=64 -> 2-step parallel grid)
    # node features: [N, 1]
    x = jax.random.normal(k_x, (N, 1), jnp.float32)
    # edge_index: [2, E] — a directed ring with both directions (2N edges)
    src = jnp.concatenate([jnp.arange(N), jnp.arange(N)])
    dst = jnp.concatenate([(jnp.arange(N) + 1) % N, (jnp.arange(N) - 1) % N])
    edge_index = jnp.stack([src, dst]).astype(jnp.int32)

    a_hat = build_normalized_adjacency(edge_index, N)
    params = init_params(k_p)

    out = net_forward(a_hat, x, params, row_tile=64)
    out = jax.block_until_ready(out)

    ref = reference_forward(a_hat, x, params)
    assert out.shape == (N, 6)
    assert jnp.allclose(out, ref, atol=1e-4, rtol=1e-4), "mismatch vs reference"
    # log_softmax rows should exponentiate-sum to 1
    assert jnp.allclose(jnp.sum(jnp.exp(out), axis=1), 1.0, atol=1e-4)

    print("KERNEL_OK")
</pallas_src>

<mosaic_0001>
module attributes {stable_mosaic.version = 11 : i64} {
  func.func @gcn_stage1_kernel(%arg0: i32, %arg1: memref<64x128xf32, #tpu.memory_space<vmem>>, %arg2: memref<128x1xf32, #tpu.memory_space<vmem>>, %arg3: memref<2x256xf32, #tpu.memory_space<vmem>>, %arg4: memref<256x64xf32, #tpu.memory_space<vmem>>, %arg5: memref<64x64xf32, #tpu.memory_space<vmem>>) attributes {dimension_semantics = [#tpu.dimension_semantics<parallel>], iteration_bounds = array<i64: 2>, scalar_prefetch = 0 : i64, scratch_operands = 0 : i64, tpu.core_type = #tpu.core_type<tc>, window_params = [{transform_indices = @transform_0, window_bounds = array<i64: 64, 128>}, {pipeline_mode = #tpu.pipeline_mode<synchronous>, transform_indices = @transform_1, window_bounds = array<i64: 128, 1>}, {pipeline_mode = #tpu.pipeline_mode<synchronous>, transform_indices = @transform_2, window_bounds = array<i64: 2, 256>}, {pipeline_mode = #tpu.pipeline_mode<synchronous>, transform_indices = @transform_3, window_bounds = array<i64: 256, 64>}, {transform_indices = @transform_4, window_bounds = array<i64: 64, 64>}]} {
    %c0 = arith.constant 0 : index
    %c0_0 = arith.constant 0 : index
    %0 = vector.load %arg1[%c0, %c0_0] : memref<64x128xf32, #tpu.memory_space<vmem>>, vector<64x128xf32>
    %c0_1 = arith.constant 0 : index
    %c0_2 = arith.constant 0 : index
    %1 = vector.load %arg2[%c0_1, %c0_2] : memref<128x1xf32, #tpu.memory_space<vmem>>, vector<128x1xf32>
    %cst = arith.constant dense<0.000000e+00> : vector<64x1xf32>
    %2 = tpu.matmul %0, %1, %cst {dimension_numbers = #tpu.dot_dimension_numbers<[1], [0], [0], [1], [0, 0, 1, 1], [], []>} : vector<64x128xf32>, vector<128x1xf32>, vector<64x1xf32> -> vector<64x1xf32>
    %c0_3 = arith.constant 0 : index
    %c0_4 = arith.constant 0 : index
    %3 = vector.load %arg3[%c0_3, %c0_4] : memref<2x256xf32, #tpu.memory_space<vmem>>, vector<1x256xf32>
    %c1 = arith.constant 1 : index
    %c0_5 = arith.constant 0 : index
    %4 = vector.load %arg3[%c1, %c0_5] : memref<2x256xf32, #tpu.memory_space<vmem>>, vector<1x256xf32>
    %5 = vector.broadcast %2 : vector<64x1xf32> to vector<64x256xf32>
    %6 = vector.broadcast %3 : vector<1x256xf32> to vector<64x256xf32>
    %7 = arith.mulf %5, %6 : vector<64x256xf32>
    %8 = vector.broadcast %4 : vector<1x256xf32> to vector<64x256xf32>
    %9 = arith.addf %7, %8 : vector<64x256xf32>
    %cst_6 = arith.constant 0.000000e+00 : f32
    %10 = vector.broadcast %cst_6 : f32 to vector<64x256xf32>
    %11 = arith.maximumf %9, %10 : vector<64x256xf32>
    %c0_7 = arith.constant 0 : index
    %c0_8 = arith.constant 0 : index
    %12 = vector.load %arg4[%c0_7, %c0_8] : memref<256x64xf32, #tpu.memory_space<vmem>>, vector<256x64xf32>
    %cst_9 = arith.constant dense<0.000000e+00> : vector<64x64xf32>
    %13 = tpu.matmul %11, %12, %cst_9 {dimension_numbers = #tpu.dot_dimension_numbers<[1], [0], [0], [1], [0, 0, 1, 1], [], []>} : vector<64x256xf32>, vector<256x64xf32>, vector<64x64xf32> -> vector<64x64xf32>
    %c0_10 = arith.constant 0 : index
    %c0_11 = arith.constant 0 : index
    %14 = vector.load %arg5[%c0_10, %c0_11] : memref<64x64xf32, #tpu.memory_space<vmem>>, vector<64x64xf32>
    tpu.vector_store %arg5[%c0_10, %c0_11], %13 {strides = array<i32>} : memref<64x64xf32, #tpu.memory_space<vmem>>, vector<64x64xf32>,
    return
  }
  func.func @transform_0(%arg0: i32) -> (i32, i32) {
    %c0_i32 = arith.constant 0 : i32
    %c0_i32_0 = arith.constant 0 : i32
    return %arg0, %c0_i32 : i32, i32
  }
  func.func @transform_1(%arg0: i32) -> (i32, i32) {
    %c0_i32 = arith.constant 0 : i32
    %c0_i32_0 = arith.constant 0 : i32
    %c0_i32_1 = arith.constant 0 : i32
    return %c0_i32, %c0_i32_0 : i32, i32
  }
  func.func @transform_2(%arg0: i32) -> (i32, i32) {
    %c0_i32 = arith.constant 0 : i32
    %c0_i32_0 = arith.constant 0 : i32
    %c0_i32_1 = arith.constant 0 : i32
    return %c0_i32, %c0_i32_0 : i32, i32
  }
  func.func @transform_3(%arg0: i32) -> (i32, i32) {
    %c0_i32 = arith.constant 0 : i32
    %c0_i32_0 = arith.constant 0 : i32
    %c0_i32_1 = arith.constant 0 : i32
    return %c0_i32, %c0_i32_0 : i32, i32
  }
  func.func @transform_4(%arg0: i32) -> (i32, i32) {
    %c0_i32 = arith.constant 0 : i32
    %c0_i32_0 = arith.constant 0 : i32
    return %arg0, %c0_i32 : i32, i32
  }
}

</mosaic_0001>

<bundles_post_ra>
// kernel: tpu_custom_call.1
= control target key start
LH: loop header
LB: loop body
LE: loop exit
PB: predicated region body
PF: predicated region fallthrough
CT: control target
= control target key end

     0   :  { %s890_s15 = smov 0   ;;  %s1122_s0 = inlined_call_operand.vmem [shape: f32[128,128], index: 0, kind: input, shape index: {}]   ;;  %s1123_s1 = inlined_call_operand.vmem [shape: f32[128,1], index: 1, kind: input, shape index: {}]   ;;  %s1124_s2 = inlined_call_operand.vmem [shape: f32[2,256], index: 2, kind: input, shape index: {}]   ;;  %s1125_s3 = inlined_call_operand.vmem [shape: f32[256,64], index: 3, kind: input, shape index: {}]   ;;  %s1126_s4 = inlined_call_operand.vmem [shape: f32[128,64], index: 4, kind: output, shape index: {}]  }
   0x1 LB: > { %s645_s16 = sadd.s32 4294967295, %s862_s15   ;;  %p649_p0 = scmp.ge.s32.totalorder %s862_s15, 1  ;;  %s862_s15 = sphi %s890_s15, %s14_s15  }
   0x2   : > { %p163_p1 = scmp.lt.s32.totalorder %s862_s15, 3 }
   0x4   : > { %p164_p2 = pnand %p649_p0, %p163_p1 }
   0x5   : > { %v209_v0 = vld [vmem:[%s1123_s1] sm:$0xff] (!%p164_p2)  ;;  %v210_v1 = vld [vmem:[%s1123_s1 + $0x8] sm:$0xff] (!%p164_p2)  ;;  %v211_v2 = vld [vmem:[%s1123_s1 + $0x10] sm:$0xff] (!%p164_p2)  ;;  %s650_s23 = sshll.u32 (!%p164_p2), %s645_s16, 3  ;;  %v864_v32 = vmov (!%p164_p2), 0   ;;  %vm580_vm0 = vcmask (!%p164_p2), 523264  }
   0x6   : > { %167 = sbr.rel (%p164_p2) target bundleno = 632 (0x278), region = 36  ;;  %v781_v3 = vpack.c.bf16 (!%p164_p2), %v210_v1, %v209_v0  ;;  %v212_v4 = vld [vmem:[%s1123_s1 + $0x18] sm:$0xff] (!%p164_p2)  ;;  %p190_p3 = scmp.lt.s32.totalorder (!%p164_p2), %s650_s23, 15  ;;  %v213_v6 = vld [vmem:[%s1123_s1 + $0x20] sm:$0xff] (!%p164_p2)  ;;  %v214_v7 = vld [vmem:[%s1123_s1 + $0x28] sm:$0xff] (!%p164_p2)  ;;  %854 = vset.pattern.permute.xlu0 (!%p164_p2), %v864_v32  ;;  %855 = vset.pattern.permute.xlu1 (!%p164_p2), %v864_v32 }
   0x7   : > { %v785_v5 = vpack.c.bf16 (!%p164_p2), %v212_v4, %v211_v2  ;;  %v789_v8 = vpack.c.bf16 (!%p164_p2), %v214_v7, %v213_v6  ;;  %v215_v9 = vld [vmem:[%s1123_s1 + $0x30] sm:$0xff] (!%p164_p2)  ;;  %v216_v10 = vld [vmem:[%s1123_s1 + $0x38] sm:$0xff] (!%p164_p2)  ;;  %v217_v13 = vld [vmem:[%s1123_s1 + $0x40] sm:$0xff] (!%p164_p2) }
   0x8   : > { %782 = vmatprep.subr.bf16.mxu0 (!%p164_p2), %v781_v3  ;;  %v793_v12 = vpack.c.bf16 (!%p164_p2), %v216_v10, %v215_v9  ;;  %v218_v14 = vld [vmem:[%s1123_s1 + $0x48] sm:$0xff] (!%p164_p2)  ;;  %v219_v16 = vld [vmem:[%s1123_s1 + $0x50] sm:$0xff] (!%p164_p2)  ;;  %v220_v17 = vld [vmem:[%s1123_s1 + $0x58] sm:$0xff] (!%p164_p2) }
   0x9   : > { %784 = vmatpush3.bf16.msra.mxu0 (!%p164_p2), %v781_v3  ;;  %v797_v15 = vpack.c.bf16 (!%p164_p2), %v218_v14, %v217_v13  ;;  %v801_v18 = vpack.c.bf16 (!%p164_p2), %v220_v17, %v219_v16  ;;  %v221_v19 = vld [vmem:[%s1123_s1 + $0x60] sm:$0xff] (!%p164_p2)  ;;  %v222_v20 = vld [vmem:[%s1123_s1 + $0x68] sm:$0xff] (!%p164_p2)  ;;  %v223_v22 = vld [vmem:[%s1123_s1 + $0x70] sm:$0xff] (!%p164_p2) }
   0xa   : > { %786 = vmatprep.subr.bf16.mxu0 (!%p164_p2), %v785_v5  ;;  %v805_v21 = vpack.c.bf16 (!%p164_p2), %v222_v20, %v221_v19  ;;  %v224_v23 = vld [vmem:[%s1123_s1 + $0x78] sm:$0xff] (!%p164_p2)  ;;  %v459_v33 = vld [vmem:[%s1125_s3 + $0x80] sm:$0xff] (!%p164_p2)  ;;  %v460_v34 = vld [vmem:[%s1125_s3 + $0x88] sm:$0xff] (!%p164_p2) }
   0xb   : > { %v809_v24 = vpack.c.bf16 (!%p164_p2), %v224_v23, %v223_v22  ;;  %v443_v35 = vld [vmem:[%s1125_s3] sm:$0xff] (!%p164_p2)  ;;  %v813_v36 = vpack.c.bf16 (!%p164_p2), %v460_v34, %v459_v33  ;;  %v444_v37 = vld [vmem:[%s1125_s3 + $0x8] sm:$0xff] (!%p164_p2)  ;;  %v461_v38 = vld [vmem:[%s1125_s3 + $0x90] sm:$0xff] (!%p164_p2) }
   0xc   : > { %v462_v39 = vld [vmem:[%s1125_s3 + $0x98] sm:$0xff] (!%p164_p2)  ;;  %v815_v40 = vpack.c.bf16 (!%p164_p2), %v444_v37, %v443_v35  ;;  %v445_v42 = vld [vmem:[%s1125_s3 + $0x10] sm:$0xff] (!%p164_p2)  ;;  %v463_v44 = vld [vmem:[%s1125_s3 + $0xa0] sm:$0xff] (!%p164_p2) }
   0xd   : > { %s1128_s23 = smov (!%p190_p3, %s650_s23), 15  ;;  %788 = vmatpush3.bf16.msra.mxu0 %v785_v5  ;;  %v817_v41 = vpack.c.bf16 %v462_v39, %v461_v38  ;;  %v446_v43 = vld [vmem:[%s1125_s3 + $0x18] sm:$0xff]  ;;  %814 = vmatprep.subr.bf16.mxu1 %v813_v36  ;;  %v464_v45 = vld [vmem:[%s1125_s3 + $0xa8] sm:$0xff]  ;;  %v447_v48 = vld [vmem:[%s1125_s3 + $0x20] sm:$0xff] }
   0xe   : > { %s651_s30 = sshll.u32 %s1128_s23, 3  ;;  %790 = vmatprep.subr.bf16.mxu0 %v789_v8  ;;  %816 = vmatpush3.bf16.msra.mxu1 %v815_v40  ;;  %v819_v46 = vpack.c.bf16 %v446_v43, %v445_v42  ;;  %v821_v47 = vpack.c.bf16 %v464_v45, %v463_v44  ;;  %v448_v49 = vld [vmem:[%s1125_s3 + $0x28] sm:$0xff]  ;;  %v465_v50 = vld [vmem:[%s1125_s3 + $0xb0] sm:$0xff]  ;;  %v466_v51 = vld [vmem:[%s1125_s3 + $0xb8] sm:$0xff] }
   0xf   : > { %s930_s11 = scalar_lea.vmem %s1122_s0, %s651_s30  ;;  %818 = vmatprep.subr.bf16.mxu1 %v817_v41  ;;  %v823_v52 = vpack.c.bf16 %v448_v49, %v447_v48  ;;  %v825_v53 = vpack.c.bf16 %v466_v51, %v465_v50  ;;  %v449_v54 = vld [vmem:[%s1125_s3 + $0x30] sm:$0xff]  ;;  %v450_v55 = vld [vmem:[%s1125_s3 + $0x38] sm:$0xff]  ;;  %v467_v56 = vld [vmem:[%s1125_s3 + $0xc0] sm:$0xff]  ;;  %s1101_s6 = scalar_lea.vmem %s1126_s4, %s651_s30 }
  0x10   : > { %v201_v11 = vld [vmem:[%s930_s11] sm:$0xff]  ;;  %v202_v25 = vld [vmem:[%s930_s11 + $0x8] sm:$0xff]  ;;  %v203_v26 = vld [vmem:[%s930_s11 + $0x10] sm:$0xff]  ;;  %v827_v58 = vpack.c.bf16 %v450_v55, %v449_v54 }
  0x11   : > { %769 = vmatprep.mubr.f32.mxu0 %v201_v11  ;;  %792 = vmatpush3.bf16.msra.mxu0 %v789_v8  ;;  %v204_v27 = vld [vmem:[%s930_s11 + $0x18] sm:$0xff]  ;;  %v205_v28 = vld [vmem:[%s930_s11 + $0x20] sm:$0xff]  ;;  %v206_v29 = vld [vmem:[%s930_s11 + $0x28] sm:$0xff] }
  0x12   : > { %794 = vmatprep.subr.bf16.mxu0 %v793_v12  ;;  %v207_v30 = vld [vmem:[%s930_s11 + $0x30] sm:$0xff]  ;;  %v208_v31 = vld [vmem:[%s930_s11 + $0x38] sm:$0xff]  ;;  %820 = vmatpush3.bf16.msra.mxu1 %v819_v46  ;;  %v468_v57 = vld [vmem:[%s1125_s3 + $0xc8] sm:$0xff] }
  0x13   : > { %822 = vmatprep.subr.bf16.mxu1 %v821_v47  ;;  %v829_v59 = vpack.c.bf16 %v468_v57, %v467_v56  ;;  %v451_v60 = vld [vmem:[%s1125_s3 + $0x40] sm:$0xff]  ;;  %v452_v61 = vld [vmem:[%s1125_s3 + $0x48] sm:$0xff]  ;;  %v469_v62 = vld [vmem:[%s1125_s3 + $0xd0] sm:$0xff] }
  0x14   : > { %v470_v63 = vld [vmem:[%s1125_s3 + $0xd8] sm:$0xff]  ;;  %v831_v0 = vpack.c.bf16 %v452_v61, %v451_v60  ;;  %v453_v2 = vld [vmem:[%s1125_s3 + $0x50] sm:$0xff]  ;;  %v471_v4 = vld [vmem:[%s1125_s3 + $0xe0] sm:$0xff] }
  0x15   : > { %796 = vmatpush3.bf16.msra.mxu0 %v793_v12  ;;  %v833_v1 = vpack.c.bf16 %v470_v63, %v469_v62  ;;  %v454_v3 = vld [vmem:[%s1125_s3 + $0x58] sm:$0xff]  ;;  %v472_v5 = vld [vmem:[%s1125_s3 + $0xe8] sm:$0xff]  ;;  %v455_v8 = vld [vmem:[%s1125_s3 + $0x60] sm:$0xff] }
  0x16   : > { %798 = vmatprep.subr.bf16.mxu0 %v797_v15  ;;  %824 = vmatpush3.bf16.msra.mxu1 %v823_v52  ;;  %v835_v6 = vpack.c.bf16 %v454_v3, %v453_v2  ;;  %v837_v7 = vpack.c.bf16 %v472_v5, %v471_v4  ;;  %v456_v9 = vld [vmem:[%s1125_s3 + $0x68] sm:$0xff]  ;;  %v473_v13 = vld [vmem:[%s1125_s3 + $0xf0] sm:$0xff]  ;;  %v474_v14 = vld [vmem:[%s1125_s3 + $0xf8] sm:$0xff] }
  0x17   : > { %826 = vmatprep.subr.bf16.mxu1 %v825_v53  ;;  %v839_v11 = vpack.c.bf16 %v456_v9, %v455_v8  ;;  %v457_v16 = vld [vmem:[%s1125_s3 + $0x70] sm:$0xff]  ;;  %v458_v17 = vld [vmem:[%s1125_s3 + $0x78] sm:$0xff] }
  0x18   : > { %v843_v19 = vpack.c.bf16 %v458_v17, %v457_v16 }
  0x19   : > { %800 = vmatpush3.bf16.msra.mxu0 %v797_v15  ;;  %v841_v15 = vpack.c.bf16 %v474_v14, %v473_v13 }
  0x1a   : > { %802 = vmatprep.subr.bf16.mxu0 %v801_v18  ;;  %828 = vmatpush3.bf16.msra.mxu1 %v827_v58 }
  0x1b   : > { %830 = vmatprep.subr.bf16.mxu1 %v829_v59 }
  0x1d   : > { %804 = vmatpush3.bf16.msra.mxu0 %v801_v18 }
  0x1e   : > { %806 = vmatprep.subr.bf16.mxu0 %v805_v21  ;;  %832 = vmatpush3.bf16.msra.mxu1 %v831_v0 }
  0x1f   : > { %834 = vmatprep.subr.bf16.mxu1 %v833_v1 }
  0x21   : > { %808 = vmatpush3.bf16.msra.mxu0 %v805_v21 }
  0x22   : > { %810 = vmatprep.subr.bf16.mxu0 %v809_v24  ;;  %836 = vmatpush3.bf16.msra.mxu1 %v835_v6 }
  0x23   : > { %838 = vmatprep.subr.bf16.mxu1 %v837_v7 }
  0x25   : > { %812 = vmatpush3.bf16.msra.mxu0 %v809_v24 }
  0x26   : > { %840 = vmatpush3.bf16.msra.mxu1 %v839_v11 }
  0x27   : > { %842 = vmatprep.subr.bf16.mxu1 %v841_v15 }
  0x28   : > { %770 = vmatmul.mubr.f32.vlgmr.msra.gmra.mrb[0].mxu0 %v202_v25  ;;  %v374_v25 = vlaneseq }
  0x29   : > { %772 = vmatprep.mubr.f32.mxu0 %v203_v26 }
  0x2a   : > { %844 = vmatpush3.bf16.msra.mxu1 %v843_v19  ;;  %v375_v26 = vshrl.u32 %v374_v25, 7 }
  0x2c   : > { %773 = vmatmul.mubr.f32.gmra.mrb[2].mxu0 %v204_v27  ;;  %v376_v27 = vsub.s32 0, %v375_v26 }
  0x2d   : > { %775 = vmatprep.mubr.f32.mxu0 %v205_v28  ;;  %v380_v28 = vsub.s32 1, %v375_v26 }
  0x30   : > { %776 = vmatmul.mubr.f32.gmra.mrb[4].mxu0 %v206_v29  ;;  %v330_v29 = vld [vmem:[%s1124_s2] ss:$2 sm:$0x3] }
  0x31   : > { %778 = vmatprep.mubr.f32.mxu0 %v207_v30  ;;  %v654_v30 = vld [vmem:[%s1124_s2 + $0x1] ss:$2 sm:$0x3]  ;;  %v381_v32 = vrot.slane %v330_v29, %v380_v28 }
  0x32   : > { %v1068_v33 = vrot.slane %v654_v30, %v376_v27  ;;  %v1070_v34 = vrot.slane %v654_v30, %v380_v28 }
  0x34   : > { %779 = vmatmul.mubr.f32.gmra.mrb[6].mxu0 %v208_v31  ;;  %v1066_v31 = vrot.slane %v330_v29, %v376_v27 }
  0xfb   : > { %v771_v10 = vpop.f32.mrb[0].mxu0 }
  0xfc   : > { %v291_v12 = vpop.f32.mrb[1].mxu0 }
  0xfd   : > { %335 = vperm.xlu0 %854, %v291_v12  }
  0xff   : > { %v774_v18 = vpop.f32.mrb[2].mxu0 }
 0x100   : > { %v301_v20 = vpop.f32.mrb[3].mxu0 }
 0x101   : > { %340 = vperm.xlu0 %854, %v771_v10   ;;  %345 = vperm.xlu1 %855, %v301_v20  }
 0x103   : > { %v777_v21 = vpop.f32.mrb[4].mxu0 }
 0x104   : > { %v311_v22 = vpop.f32.mrb[5].mxu0 }
 0x105   : > { %350 = vperm.xlu1 %855, %v774_v18   ;;  %355 = vperm.xlu0 %854, %v311_v22  }
 0x107   : > { %v780_v23 = vpop.f32.mrb[6].mxu0 }
 0x108   : > { %v321_v24 = vpop.f32.mrb[7].mxu0 }
 0x109   : > { %360 = vperm.xlu1 %855, %v777_v21   ;;  %365 = vperm.xlu0 %854, %v321_v24  }
 0x10d   : > { %370 = vperm.xlu1 %855, %v780_v23  }
 0x17c   : > { %v336_v35 = vpop.permute.xlu0 %335 }
 0x17d   : > { %v384_v36 = vmul.f32 %v1066_v31, %v336_v35  ;;  %v385_v37 = vmul.f32 %v381_v32, %v336_v35 }
 0x17f   : > { %v411_v38 = vadd.f32 %v1068_v33, %v384_v36  ;;  %v412_v39 = vadd.f32 %v1070_v34, %v385_v37 }
 0x180   : > { %v341_v40 = vpop.permute.xlu0 %340  ;;  %v346_v41 = vpop.permute.xlu1 %345 }
 0x181   : > { %v386_v42 = vmul.f32 %v1066_v31, %v341_v40  ;;  %v387_v43 = vmul.f32 %v381_v32, %v341_v40  ;;  %v389_v44 = vmul.f32 %v381_v32, %v346_v41  ;;  %v428_v45 = vmax.f32 %v412_v39, 0.0 }
 0x182   : > { %v427_v46 = vmax.f32 %v411_v38, 0.0  ;;  %v388_v49 = vmul.f32 %v1066_v31, %v346_v41 }
 0x183   : > { %v413_v47 = vadd.f32 %v1068_v33, %v386_v42  ;;  %v414_v48 = vadd.f32 %v1070_v34, %v387_v43  ;;  %v416_v50 = vadd.f32 %v1070_v34, %v389_v44  ;;  %539 = vmatprep.mubr.f32.mxu1 %v428_v45 }
 0x184   : > { %v351_v51 = vpop.permute.xlu1 %350  ;;  %540 = vmatmul.mubr.f32.vlgmr.msra.gmra.mrb[0].mxu1 %v427_v46  ;;  %v356_v53 = vpop.permute.xlu0 %355  ;;  %v415_v57 = vadd.f32 %v1068_v33, %v388_v49 }
 0x185   : > { %v391_v52 = vmul.f32 %v381_v32, %v351_v51  ;;  %v430_v54 = vmax.f32 %v414_v48, 0.0  ;;  %v429_v55 = vmax.f32 %v413_v47, 0.0  ;;  %v432_v56 = vmax.f32 %v416_v50, 0.0 }
 0x186   : > { %v390_v58 = vmul.f32 %v1066_v31, %v351_v51  ;;  %v393_v60 = vmul.f32 %v381_v32, %v356_v53  ;;  %v392_v63 = vmul.f32 %v1066_v31, %v356_v53  ;;  %v431_v0 = vmax.f32 %v415_v57, 0.0 }
 0x187   : > { %v418_v59 = vadd.f32 %v1070_v34, %v391_v52  ;;  %544 = vmatprep.mubr.f32.mxu1 %v430_v54 }
 0x188   : > { %545 = vmatmul.mubr.f32.gmra.mrb[2].mxu1 %v429_v55  ;;  %v361_v61 = vpop.permute.xlu1 %360  ;;  %v417_v62 = vadd.f32 %v1068_v33, %v390_v58  ;;  %v420_v1 = vadd.f32 %v1070_v34, %v393_v60  ;;  %v366_v4 = vpop.permute.xlu0 %365  ;;  %v419_v5 = vadd.f32 %v1068_v33, %v392_v63 }
 0x189   : > { %549 = vmatprep.mubr.f32.mxu1 %v432_v56  ;;  %v395_v2 = vmul.f32 %v381_v32, %v361_v61  ;;  %v434_v3 = vmax.f32 %v418_v59, 0.0  ;;  %v394_v6 = vmul.f32 %v1066_v31, %v361_v61  ;;  %v397_v9 = vmul.f32 %v381_v32, %v366_v4 }
 0x18a   : > { %v433_v7 = vmax.f32 %v417_v62, 0.0  ;;  %v436_v10 = vmax.f32 %v420_v1, 0.0  ;;  %v396_v13 = vmul.f32 %v1066_v31, %v366_v4  ;;  %v435_v14 = vmax.f32 %v419_v5, 0.0 }
 0x18b   : > { %v422_v8 = vadd.f32 %v1070_v34, %v395_v2  ;;  %v421_v12 = vadd.f32 %v1068_v33, %v394_v6  ;;  %v424_v15 = vadd.f32 %v1070_v34, %v397_v9 }
 0x18c   : > { %550 = vmatmul.mubr.f32.gmra.mrb[4].mxu1 %v431_v0  ;;  %v371_v11 = vpop.permute.xlu1 %370  ;;  %v423_v18 = vadd.f32 %v1068_v33, %v396_v13 }
 0x18d   : > { %554 = vmatprep.mubr.f32.mxu1 %v434_v3  ;;  %v399_v16 = vmul.f32 %v381_v32, %v371_v11  ;;  %v438_v17 = vmax.f32 %v422_v8, 0.0  ;;  %v398_v19 = vmul.f32 %v1066_v31, %v371_v11  ;;  %v437_v20 = vmax.f32 %v421_v12, 0.0 }
 0x18e   : > { %v440_v21 = vmax.f32 %v424_v15, 0.0  ;;  %v439_v23 = vmax.f32 %v423_v18, 0.0 }
 0x18f   : > { %v426_v22 = vadd.f32 %v1070_v34, %v399_v16  ;;  %v425_v24 = vadd.f32 %v1068_v33, %v398_v19 }
 0x190   : > { %555 = vmatmul.mubr.f32.gmra.mrb[6].mxu1 %v433_v7 }
 0x191   : > { %559 = vmatprep.mubr.f32.mxu1 %v436_v10  ;;  %v442_v25 = vmax.f32 %v426_v22, 0.0  ;;  %v441_v26 = vmax.f32 %v425_v24, 0.0 }
 0x194   : > { %560 = vmatmul.mubr.f32.gmra.mrb[8].mxu1 %v435_v14 }
 0x195   : > { %564 = vmatprep.mubr.f32.mxu1 %v438_v17 }
 0x198   : > { %565 = vmatmul.mubr.f32.gmra.mrb[10].mxu1 %v437_v20 }
 0x199   : > { %569 = vmatprep.mubr.f32.mxu1 %v440_v21 }
 0x19c   : > { %570 = vmatmul.mubr.f32.gmra.mrb[12].mxu1 %v439_v23 }
 0x19d   : > { %574 = vmatprep.mubr.f32.mxu1 %v442_v25 }
 0x1a0   : > { %575 = vmatmul.mubr.f32.gmra.mrb[14].mxu1 %v441_v26 }
 0x257   : > { %v713_v27 = vpop.f32.mrb[0].mxu1 }
 0x258   : > { %v714_v28 = vpop.f32.mrb[1].mxu1 }
 0x259   : > { %v715_v29 = vadd.f32 %v714_v28, %v713_v27 }
 0x25b   : > { %581 = vst.msk [vmem:[%s1101_s6] sm:$0xff] %vm580_vm0, %v715_v29  ;;  %v716_v30 = vpop.f32.mrb[2].mxu1 }
 0x25c   : > { %v717_v31 = vpop.f32.mrb[3].mxu1 }
 0x25d   : > { %v718_v32 = vadd.f32 %v717_v31, %v716_v30 }
 0x25f   : > { %582 = vst.msk [vmem:[%s1101_s6 + $0x8] sm:$0xff] %vm580_vm0, %v718_v32  ;;  %v719_v33 = vpop.f32.mrb[4].mxu1 }
 0x260   : > { %v720_v34 = vpop.f32.mrb[5].mxu1 }
 0x261   : > { %v721_v35 = vadd.f32 %v720_v34, %v719_v33 }
 0x263   : > { %583 = vst.msk [vmem:[%s1101_s6 + $0x10] sm:$0xff] %vm580_vm0, %v721_v35  ;;  %v722_v36 = vpop.f32.mrb[6].mxu1 }
 0x264   : > { %v723_v37 = vpop.f32.mrb[7].mxu1 }
 0x265   : > { %v724_v38 = vadd.f32 %v723_v37, %v722_v36 }
 0x267   : > { %584 = vst.msk [vmem:[%s1101_s6 + $0x18] sm:$0xff] %vm580_vm0, %v724_v38  ;;  %v725_v39 = vpop.f32.mrb[8].mxu1 }
 0x268   : > { %v726_v40 = vpop.f32.mrb[9].mxu1 }
 0x269   : > { %v727_v41 = vadd.f32 %v726_v40, %v725_v39 }
 0x26b   : > { %585 = vst.msk [vmem:[%s1101_s6 + $0x20] sm:$0xff] %vm580_vm0, %v727_v41  ;;  %v728_v42 = vpop.f32.mrb[10].mxu1 }
 0x26c   : > { %v729_v43 = vpop.f32.mrb[11].mxu1 }
 0x26d   : > { %v730_v44 = vadd.f32 %v729_v43, %v728_v42 }
 0x26f   : > { %586 = vst.msk [vmem:[%s1101_s6 + $0x28] sm:$0xff] %vm580_vm0, %v730_v44  ;;  %v731_v45 = vpop.f32.mrb[12].mxu1 }
 0x270   : > { %v732_v46 = vpop.f32.mrb[13].mxu1 }
 0x271   : > { %v733_v47 = vadd.f32 %v732_v46, %v731_v45 }
 0x273   : > { %587 = vst.msk [vmem:[%s1101_s6 + $0x30] sm:$0xff] %vm580_vm0, %v733_v47  ;;  %v734_v48 = vpop.f32.mrb[14].mxu1 }
 0x274   : > { %v735_v49 = vpop.f32.mrb[15].mxu1 }
 0x275   : > { %v736_v50 = vadd.f32 %v735_v49, %v734_v48 }
 0x277   : > { %588 = vst.msk [vmem:[%s1101_s6 + $0x38] sm:$0xff] %vm580_vm0, %v736_v50 }
 0x278 PF: > { %s14_s15 = sadd.s32 1, %s862_s15  }
 0x279   : > { %p11_p4 = scmp.ge.s32.totalorder %s14_s15, 4  }
 0x27b   :  { %13 = sbr.rel (!%p11_p4) target bundleno = 1 (0x1), region = 67 }

</bundles_post_ra>
